<compile_context>
chip_gen: v6e
topology: v6e:2x2x1
jax: 0.10.0
libtpu: 0.0.40
codegen_flags: <defaults>
</compile_context>

<pallas_src>
import jax
import jax.numpy as jnp
from jax import lax
from jax.experimental import pallas as pl
from jax.experimental.pallas import tpu as pltpu

# Small, TPU-friendly shapes consistent with the module's forward.
B = 8          # number of segments (batch)
S = 16         # tokens per segment
H = 128        # hidden size (koelectra-base uses 768; scaled down, lane-aligned)
VOCAB = 1000
LANE = 128     # lane width for the lane-dense fused pooler output slab
CLS_PAD = 16   # CLS/context rows padded to a full bf16 (16,128) packed tile
POOL_ROWS = CLS_PAD + B * S   # 144 rows: [ctx | pad | all tokens]


def head_kernel(hidden2d_ref, wqkv_ref, bqkv_ref, wpool_ref, bpool_ref,
                out_ref, pool_in):
    # ---- load hidden once in f32; bf16 casts happen in-kernel ----
    hid2d = hidden2d_ref[...]                                       # [B*S, H] f32

    # ---- gather the B CLS rows in-kernel (no separate cls input DMA) ----
    cls = hid2d.reshape(B, S, H)[:, 0, :].astype(jnp.bfloat16)      # [B, H] bf16

    # ---- fused Q/K/V projection (1/sqrt(H) folded into wq/bq) ----
    qkv = (jnp.dot(cls, wqkv_ref[...],
                   preferred_element_type=jnp.float32)
           + bqkv_ref[...])                                         # [B, 3H] f32
    q = qkv[:, 0 * H:1 * H]
    k = qkv[:, 1 * H:2 * H]
    v = qkv[:, 2 * H:3 * H]

    # ---- scores = (q/temp) @ k^T as a bf16 MXU pass (f32 accumulation) ----
    scores = lax.dot_general(q.astype(jnp.bfloat16), k.astype(jnp.bfloat16),
                             (((1,), (1,)), ((), ())),
                             preferred_element_type=jnp.float32)    # [B, B]

    # ---- softmax in f32 (exact division); dropout(0.1) is identity in eval ----
    scores = scores - jnp.max(scores, axis=-1, keepdims=True)
    p = jnp.exp(scores)
    attn = p / jnp.sum(p, axis=-1, keepdims=True)                   # [B, B] f32

    # ---- context = attn @ v, bf16 operands / f32 accumulation ----
    ctx = jnp.dot(attn.astype(jnp.bfloat16), v.astype(jnp.bfloat16),
                  preferred_element_type=jnp.float32)               # [B, H] f32

    # ---- build the stacked pooler input: [ctx | zero pad | all tokens] ----
    ctx16 = jnp.concatenate(
        [ctx, jnp.zeros((CLS_PAD - B, H), jnp.float32)], axis=0)    # [16, H]
    pool_in[0:CLS_PAD, :] = ctx16.astype(jnp.bfloat16)
    pool_in[CLS_PAD:POOL_ROWS, :] = hid2d.astype(jnp.bfloat16)

    # ---- ONE fused pooler matmul: col 0 = segment logits, cols 1:3 = span ----
    out_ref[...] = (jnp.dot(pool_in[...], wpool_ref[...],
                            preferred_element_type=jnp.float32)
                    + bpool_ref[...])                               # [144, 128]


# Advisory cost for XLA's scheduler (this is a tiny, overhead-bound op).
_FLOPS = (2 * B * H * 3 * H          # fused QKV
          + 2 * B * B * H            # scores
          + 2 * B * B * H            # attn @ v
          + 2 * POOL_ROWS * H * LANE)  # fused pooler
_BYTES = (B * S * H * 4              # hidden f32 in
          + H * 3 * H * 2 + 3 * H * 4  # wqkv / bqkv
          + H * LANE * 2 + LANE * 4    # fused pooler weight / bias
          + POOL_ROWS * LANE * 4)      # output slab


def electra_korquad_head(hidden, kparams):
    """hidden: [B, S, H] f32 encoder output. Returns (segment [B,1], span [B,S,2])."""
    wqkv, bqkv, w_pool, b_pool = kparams
    # Metadata-only reshape; hidden stays f32 (bf16 cast happens in-kernel).
    hidden2d = hidden.reshape(B * S, H)

    vmem = pl.BlockSpec(memory_space=pltpu.MemorySpace.VMEM)
    pooled = pl.pallas_call(
        head_kernel,
        out_shape=jax.ShapeDtypeStruct((POOL_ROWS, LANE), jnp.float32),
        in_specs=[vmem] * 5,
        out_specs=vmem,
        scratch_shapes=[pltpu.VMEM((POOL_ROWS, H), jnp.bfloat16)],
        cost_estimate=pl.CostEstimate(flops=_FLOPS, transcendentals=B * B,
                                      bytes_accessed=_BYTES),
    )(hidden2d, wqkv, bqkv, w_pool, b_pool)

    out_segment = pooled[:B, 0:1]                                 # [B, 1]
    out_span = pooled[CLS_PAD:, 1:3].reshape(B, S, 2)             # [B, S, 2]
    return out_segment, out_span


def init_raw_params(key):
    """PyTorch-style per-layer weights (Linear stored as [in, out]; y = x @ W + b)."""
    ks = jax.random.split(key, 11)
    scale = 1.0 / (H ** 0.5)
    wq = jax.random.normal(ks[0], (H, H), jnp.float32) * scale
    bq = jax.random.normal(ks[1], (1, H), jnp.float32) * 0.01
    wk = jax.random.normal(ks[2], (H, H), jnp.float32) * scale
    bk = jax.random.normal(ks[3], (1, H), jnp.float32) * 0.01
    wv = jax.random.normal(ks[4], (H, H), jnp.float32) * scale
    bv = jax.random.normal(ks[5], (1, H), jnp.float32) * 0.01
    wseg = jax.random.normal(ks[6], (H, 1), jnp.float32) * scale
    bseg = jax.random.normal(ks[7], (1, 1), jnp.float32) * 0.01
    wspan = jax.random.normal(ks[8], (H, 2), jnp.float32) * scale
    bspan = jax.random.normal(ks[9], (1, 2), jnp.float32) * 0.01
    emb = jax.random.normal(ks[10], (VOCAB, H), jnp.float32) * 0.02
    return (wq, bq, wk, bk, wv, bv, wseg, bseg, wspan, bspan), emb


def prepare_kernel_params(raw):
    """One-time constant folding into a TPU-friendly layout:
       * fuse wq|wk|wv -> [H, 3H] bf16 (1/sqrt(H) folded into the q columns & bias)
       * fuse segment + span poolers into ONE lane-dense [H, 128] weight:
         column 0 = segment head, columns 1:3 = span head, rest zero;
         single [1, 128] f32 bias slab laid out the same way.
    """
    wq, bq, wk, bk, wv, bv, wseg, bseg, wspan, bspan = raw
    inv_temp = jnp.float32(1.0 / (H ** 0.5))
    wqkv = jnp.concatenate([wq * inv_temp, wk, wv], axis=1).astype(jnp.bfloat16)  # [H, 3H]
    bqkv = jnp.concatenate([bq * inv_temp, bk, bv], axis=1).astype(jnp.float32)   # [1, 3H]

    w_pool = jnp.zeros((H, LANE), jnp.float32)
    w_pool = w_pool.at[:, 0:1].set(wseg).at[:, 1:3].set(wspan)
    w_pool = w_pool.astype(jnp.bfloat16)                                          # [H, 128]
    b_pool = jnp.zeros((1, LANE), jnp.float32)
    b_pool = b_pool.at[:, 0:1].set(bseg).at[:, 1:3].set(bspan)                    # [1, 128]
    return (wqkv, bqkv, w_pool, b_pool)


def reference_head(hidden, kparams):
    """Pure-JAX reference mirroring the kernel's dtype flow (bf16 matmuls, f32 acc)."""
    wqkv, bqkv, w_pool, b_pool = kparams
    cls = hidden[:, 0, :].astype(jnp.bfloat16)                      # [B, H]
    qkv = jnp.dot(cls, wqkv, preferred_element_type=jnp.float32) + bqkv
    q, k, v = qkv[:, :H], qkv[:, H:2 * H], qkv[:, 2 * H:]
    scores = lax.dot_general(q.astype(jnp.bfloat16), k.astype(jnp.bfloat16),
                             (((1,), (1,)), ((), ())),
                             preferred_element_type=jnp.float32)
    scores = scores - jnp.max(scores, axis=-1, keepdims=True)
    p = jnp.exp(scores)
    attn = p / jnp.sum(p, axis=-1, keepdims=True)
    ctx = jnp.dot(attn.astype(jnp.bfloat16), v.astype(jnp.bfloat16),
                  preferred_element_type=jnp.float32)
    seg = jnp.dot(ctx.astype(jnp.bfloat16), w_pool,
                  preferred_element_type=jnp.float32) + b_pool
    hid2d = hidden.reshape(B * S, H).astype(jnp.bfloat16)
    span = jnp.dot(hid2d, w_pool, preferred_element_type=jnp.float32) + b_pool
    return seg[:, 0:1], span[:, 1:3].reshape(B, S, 2)


if __name__ == "__main__":
    key = jax.random.PRNGKey(0)
    pkey, xkey = jax.random.split(key)
    raw_params, emb = init_raw_params(pkey)
    kparams = prepare_kernel_params(raw_params)

    # x: token ids [B, S] (the input to ElectraKorquad.forward)
    x = jax.random.randint(xkey, (B, S), 0, VOCAB, dtype=jnp.int32)

    # Electra backbone stub (plain-JAX glue): embedding lookup -> hidden [B, S, H].
    # TODO(synk): pretrained 12-layer ElectraModel encoder is checkpoint-loaded in
    #             the original module and is not reimplemented here.
    hidden = emb[x]

    out_segment, out_span = jax.jit(electra_korquad_head)(hidden, kparams)
    jax.block_until_ready((out_segment, out_span))

    ref_seg, ref_span = reference_head(hidden, kparams)
    assert out_segment.shape == (B, 1) and out_span.shape == (B, S, 2)
    assert jnp.allclose(out_segment, ref_seg, atol=1e-3, rtol=1e-2)
    assert jnp.allclose(out_span, ref_span, atol=1e-3, rtol=1e-2)

    print("KERNEL_OK")
</pallas_src>

<mosaic_0001>
module attributes {stable_mosaic.version = 11 : i64} {
  func.func @head_kernel(%arg0: memref<128x128xf32, #tpu.memory_space<vmem>>, %arg1: memref<128x384xbf16, #tpu.memory_space<vmem>>, %arg2: memref<1x384xf32, #tpu.memory_space<vmem>>, %arg3: memref<128x128xbf16, #tpu.memory_space<vmem>>, %arg4: memref<1x128xf32, #tpu.memory_space<vmem>>, %arg5: memref<144x128xf32, #tpu.memory_space<vmem>>, %arg6: memref<144x128xbf16, #tpu.memory_space<vmem>>) attributes {dimension_semantics = [], scalar_prefetch = 0 : i64, scratch_operands = 1 : i64, tpu.core_type = #tpu.core_type<tc>} {
    %c0 = arith.constant 0 : index
    %c0_0 = arith.constant 0 : index
    %0 = vector.load %arg0[%c0, %c0_0] : memref<128x128xf32, #tpu.memory_space<vmem>>, vector<128x128xf32>
    %1 = vector.shape_cast %0 : vector<128x128xf32> to vector<8x16x128xf32>
    %2 = vector.extract_strided_slice %1 {offsets = [0, 0, 0], sizes = [8, 1, 128], strides = [1, 1, 1]} : vector<8x16x128xf32> to vector<8x1x128xf32>
    %3 = vector.shape_cast %2 : vector<8x1x128xf32> to vector<8x128xf32>
    %4 = arith.truncf %3 : vector<8x128xf32> to vector<8x128xbf16>
    %c0_1 = arith.constant 0 : index
    %c0_2 = arith.constant 0 : index
    %5 = vector.load %arg1[%c0_1, %c0_2] : memref<128x384xbf16, #tpu.memory_space<vmem>>, vector<128x384xbf16>
    %cst = arith.constant dense<0.000000e+00> : vector<8x384xf32>
    %6 = tpu.matmul %4, %5, %cst {dimension_numbers = #tpu.dot_dimension_numbers<[1], [0], [0], [1], [0, 0, 1, 1], [], []>} : vector<8x128xbf16>, vector<128x384xbf16>, vector<8x384xf32> -> vector<8x384xf32>
    %c0_3 = arith.constant 0 : index
    %c0_4 = arith.constant 0 : index
    %7 = vector.load %arg2[%c0_3, %c0_4] : memref<1x384xf32, #tpu.memory_space<vmem>>, vector<1x384xf32>
    %8 = vector.broadcast %7 : vector<1x384xf32> to vector<8x384xf32>
    %9 = arith.addf %6, %8 : vector<8x384xf32>
    %10 = vector.extract_strided_slice %9 {offsets = [0, 0], sizes = [8, 128], strides = [1, 1]} : vector<8x384xf32> to vector<8x128xf32>
    %11 = vector.extract_strided_slice %9 {offsets = [0, 128], sizes = [8, 128], strides = [1, 1]} : vector<8x384xf32> to vector<8x128xf32>
    %12 = vector.extract_strided_slice %9 {offsets = [0, 256], sizes = [8, 128], strides = [1, 1]} : vector<8x384xf32> to vector<8x128xf32>
    %13 = arith.truncf %10 : vector<8x128xf32> to vector<8x128xbf16>
    %14 = arith.truncf %11 : vector<8x128xf32> to vector<8x128xbf16>
    %cst_5 = arith.constant dense<0.000000e+00> : vector<8x8xf32>
    %15 = tpu.matmul %13, %14, %cst_5 {dimension_numbers = #tpu.dot_dimension_numbers<[1], [1], [0], [0], [0, 0, 1, 0], [], []>} : vector<8x128xbf16>, vector<8x128xbf16>, vector<8x8xf32> -> vector<8x8xf32>
    %cst_6 = arith.constant dense<0xFF800000> : vector<8xf32>
    %16 = vector.multi_reduction <maximumf>, %15, %cst_6 [1] : vector<8x8xf32> to vector<8xf32>
    %17 = vector.shape_cast %16 : vector<8xf32> to vector<8x1xf32>
    %18 = vector.broadcast %17 : vector<8x1xf32> to vector<8x8xf32>
    %19 = arith.subf %15, %18 : vector<8x8xf32>
    %20 = math.exp %19 : vector<8x8xf32>
    %cst_7 = arith.constant dense<0.000000e+00> : vector<8xf32>
    %21 = vector.multi_reduction <add>, %20, %cst_7 [1] : vector<8x8xf32> to vector<8xf32>
    %22 = vector.shape_cast %21 : vector<8xf32> to vector<8x1xf32>
    %23 = vector.broadcast %22 : vector<8x1xf32> to vector<8x8xf32>
    %24 = arith.divf %20, %23 : vector<8x8xf32>
    %25 = arith.truncf %24 : vector<8x8xf32> to vector<8x8xbf16>
    %26 = arith.truncf %12 : vector<8x128xf32> to vector<8x128xbf16>
    %cst_8 = arith.constant dense<0.000000e+00> : vector<8x128xf32>
    %27 = tpu.matmul %25, %26, %cst_8 {dimension_numbers = #tpu.dot_dimension_numbers<[1], [0], [0], [1], [0, 0, 1, 1], [], []>} : vector<8x8xbf16>, vector<8x128xbf16>, vector<8x128xf32> -> vector<8x128xf32>
    %cst_9 = arith.constant 0.000000e+00 : f32
    %28 = vector.broadcast %cst_9 : f32 to vector<8x128xf32>
    %29 = tpu.concatenate %27, %28 in 0 : vector<8x128xf32>, vector<8x128xf32> -> vector<16x128xf32>
    %30 = arith.truncf %29 : vector<16x128xf32> to vector<16x128xbf16>
    %c0_10 = arith.constant 0 : index
    %c0_11 = arith.constant 0 : index
    %31 = vector.load %arg6[%c0_10, %c0_11] : memref<144x128xbf16, #tpu.memory_space<vmem>>, vector<16x128xbf16>
    tpu.vector_store %arg6[%c0_10, %c0_11], %30 {strides = array<i32>} : memref<144x128xbf16, #tpu.memory_space<vmem>>, vector<16x128xbf16>,
    %32 = arith.truncf %0 : vector<128x128xf32> to vector<128x128xbf16>
    %c16 = arith.constant 16 : index
    %c0_12 = arith.constant 0 : index
    %33 = vector.load %arg6[%c16, %c0_12] : memref<144x128xbf16, #tpu.memory_space<vmem>>, vector<128x128xbf16>
    tpu.vector_store %arg6[%c16, %c0_12], %32 {strides = array<i32>} : memref<144x128xbf16, #tpu.memory_space<vmem>>, vector<128x128xbf16>,
    %c0_13 = arith.constant 0 : index
    %c0_14 = arith.constant 0 : index
    %34 = vector.load %arg6[%c0_13, %c0_14] : memref<144x128xbf16, #tpu.memory_space<vmem>>, vector<144x128xbf16>
    %c0_15 = arith.constant 0 : index
    %c0_16 = arith.constant 0 : index
    %35 = vector.load %arg3[%c0_15, %c0_16] : memref<128x128xbf16, #tpu.memory_space<vmem>>, vector<128x128xbf16>
    %cst_17 = arith.constant dense<0.000000e+00> : vector<144x128xf32>
    %36 = tpu.matmul %34, %35, %cst_17 {dimension_numbers = #tpu.dot_dimension_numbers<[1], [0], [0], [1], [0, 0, 1, 1], [], []>} : vector<144x128xbf16>, vector<128x128xbf16>, vector<144x128xf32> -> vector<144x128xf32>
    %c0_18 = arith.constant 0 : index
    %c0_19 = arith.constant 0 : index
    %37 = vector.load %arg4[%c0_18, %c0_19] : memref<1x128xf32, #tpu.memory_space<vmem>>, vector<1x128xf32>
    %38 = vector.broadcast %37 : vector<1x128xf32> to vector<144x128xf32>
    %39 = arith.addf %36, %38 : vector<144x128xf32>
    %c0_20 = arith.constant 0 : index
    %c0_21 = arith.constant 0 : index
    %40 = vector.load %arg5[%c0_20, %c0_21] : memref<144x128xf32, #tpu.memory_space<vmem>>, vector<144x128xf32>
    tpu.vector_store %arg5[%c0_20, %c0_21], %39 {strides = array<i32>} : memref<144x128xf32, #tpu.memory_space<vmem>>, vector<144x128xf32>,
    return
  }
}

</mosaic_0001>

<bundles_post_ra>
// kernel: electra_korquad_head.1
= control target key start
LH: loop header
LB: loop body
LE: loop exit
PB: predicated region body
PF: predicated region fallthrough
CT: control target
= control target key end

     0   :  { %10 = vsyncpa [#allocation4], 0  ;;  %s1404_s0 = inlined_call_operand.hbm [shape: f32[128,128], index: 0, kind: input, shape index: {}]   ;;  %s1405_s1 = inlined_call_operand.hbm [shape: bf16[128,384], index: 1, kind: input, shape index: {}]   ;;  %s1406_s2 = inlined_call_operand.vmem [shape: f32[1,384], index: 2, kind: input, shape index: {}]   ;;  %s1407_s3 = inlined_call_operand.hbm [shape: bf16[128,128], index: 3, kind: input, shape index: {}]   ;;  %s1408_s4 = inlined_call_operand.vmem [shape: f32[1,128], index: 4, kind: input, shape index: {}]   ;;  %s1409_s5 = inlined_call_operand.vmem [shape: f32[144,128], index: 5, kind: output, shape index: {}]  }
   0x1   :  { %11 = vsyncpa [#allocation6], 0  ;;  %s1222_s18 = smov [#allocation5]  }
   0x2   :  { %s29_s19 = sshll.u32 %s1222_s18, 4  ;;  %s30_s19 = int_to_ptr.vmem [resolvable:$true] %s29_s19 }
   0x3   :  { %s1166_s20 = scalar_lea.vmem %s30_s19, 3072  ;;  %p1171_p1 = scmp.lt.s32.totalorder %s30_s19, %s30_s19 }
   0x4   :  { %p1167_p0 = scmp.ne.s32.totalorder %s30_s19, %s1166_s20  ;;  %p1172_p2 = scmp.lt.s32.totalorder %s1166_s20, %s1166_s20 }
   0x6   :  { %p1173_p3 = por %p1172_p2, %p1171_p1 }
   0x8   :  { %p1174_p4 = pnand %p1173_p3, %p1167_p0 }
   0xa   :  { %1177 = shalt.err (!%p1174_p4)
}
   0xb   :  { %s1223_s21 = smov 192   ;;  %s1224_s22 = smov 12  }
   0xc   :  { %35 = dma.hbm_to_vmem [thread:$0]  %s1405_s1, 3072, %s30_s19, [#allocation6], %s1223_s21, %s1223_s21, %s1224_s22  }
   0xd   :  { %s1225_s25 = smov [#allocation3]  }
   0xe   :  { %s17_s26 = sshll.u32 %s1225_s25, 4  ;;  %s18_s26 = int_to_ptr.vmem [resolvable:$true] %s17_s26 }
   0xf   :  { %s1186_s27 = scalar_lea.vmem %s18_s26, 2048  ;;  %p1191_p6 = scmp.lt.s32.totalorder %s18_s26, %s18_s26 }
  0x10   :  { %p1187_p5 = scmp.ne.s32.totalorder %s18_s26, %s1186_s27  ;;  %p1192_p7 = scmp.lt.s32.totalorder %s1186_s27, %s1186_s27 }
  0x12   :  { %p1193_p8 = por %p1192_p7, %p1191_p6 }
  0x14   :  { %p1194_p9 = pnand %p1193_p8, %p1187_p5 }
  0x16   :  { %1197 = shalt.err (!%p1194_p9)
}
  0x17   :  { %s1226_s28 = smov 128   ;;  %s1227_s29 = smov 8  }
  0x18   :  { %23 = dma.hbm_to_vmem [thread:$0]  %s1404_s0, 2048, %s18_s26, [#allocation4], %s1226_s28, %s1226_s28, %s1227_s29  }
  0x19   :  { %s1228_s7 = smov [#allocation7]  }
  0x1a   :  { %s43_s8 = sshll.u32 %s1228_s7, 4  ;;  %s44_s8 = int_to_ptr.vmem [resolvable:$true] %s43_s8 }
  0x1b   :  { %s1206_s1 = scalar_lea.vmem %s44_s8, 1024  ;;  %p1211_p11 = scmp.lt.s32.totalorder %s44_s8, %s44_s8 }
  0x1c   :  { %p1207_p10 = scmp.ne.s32.totalorder %s44_s8, %s1206_s1  ;;  %p1212_p12 = scmp.lt.s32.totalorder %s1206_s1, %s1206_s1 }
  0x1e   :  { %p1213_p13 = por %p1212_p12, %p1211_p11 }
  0x20   :  { %p1214_p0 = pnand %p1213_p13, %p1207_p10 }
  0x22   :  { %1217 = shalt.err (!%p1214_p0)
}
  0x23   :  { %s1229_s9 = smov 64   ;;  %s1230_s10 = smov 4  }
  0x24   :  { %49 = dma.hbm_to_vmem [thread:$0]  %s1407_s3, 1024, %s44_s8, [#allocation6], %s1229_s9, %s1229_s9, %s1230_s10  }
  0x25   :  { %1218 = dma.done.wait [#allocation4], 2048  }
  0x26   :  { %1219 = vsyncadd [#allocation4], 4294965248 }
  0x27   :  { %1220 = dma.done.wait [#allocation6], 4096  }
  0x28   :  { %1221 = vsyncadd [#allocation6], 4294963200  ;;  %v1231_v0 = vmov 0   ;;  %v1232_v1 = vmov 0.0   ;;  %v1105_v2 = vld [vmem:[#allocation5 + $0xac] ss:$12 sps:$4 sm:$0xff]  }
  0x29   :  { %334 = vmatprep.mubr.bf16.mxu1 %v1231_v0  ;;  %1041 = vmatprep.subr.bf16.mxu0 %v1232_v1  ;;  %v1107_v3 = vld [vmem:[#allocation5 + $0xa8] ss:$12 sps:$4 sm:$0xff]   ;;  %v1110_v5 = vld [vmem:[#allocation5 + $0x90] ss:$12 sps:$4 sm:$0xff]   ;;  %v1113_v7 = vld [vmem:[#allocation5 + $0x78] ss:$12 sps:$4 sm:$0xff]  }
  0x2a   :  { %302 = vmatprep.subr.bf16.mxu1 %v1105_v2  ;;  %v1108_v4 = vld [vmem:[#allocation5 + $0x94] ss:$12 sps:$4 sm:$0xff]   ;;  %v1111_v6 = vld [vmem:[#allocation5 + $0x7c] ss:$12 sps:$4 sm:$0xff]   ;;  %v1114_v8 = vld [vmem:[#allocation5 + $0x64] ss:$12 sps:$4 sm:$0xff]  }
  0x2b   :  { %303 = vmatpush1.bf16.msra.mxu1 %v1107_v3  ;;  %v1116_v9 = vld [vmem:[#allocation5 + $0x60] ss:$12 sps:$4 sm:$0xff]   ;;  %v64_v13 = vld [vmem:[#allocation3 + $0x10] sm:$0xff]  ;;  %v65_v14 = vld [vmem:[#allocation3 + $0x18] sm:$0xff]  ;;  %vm152_vm0 = vcmask 1041409   ;;  %vm155_vm1 = vcmask 1042434  }
  0x2c   :  { %304 = vmatprep.subr.bf16.mxu1 %v1108_v4  ;;  %v1117_v10 = vld [vmem:[#allocation5 + $0x4c] ss:$12 sps:$4 sm:$0xff]   ;;  %v62_v11 = vld [vmem:[#allocation3] sm:$0xff]  ;;  %vm158_vm2 = vcmask 1043459   ;;  %v68_v18 = vld [vmem:[#allocation3 + $0x30] sm:$0xff]  ;;  %v79_v19 = vpack.c.bf16 %v64_v13, %v64_v13  ;;  %vm161_vm3 = vcmask 1044484   ;;  %v939_v21 = vpack.c.bf16 %v65_v14, %v64_v13 }
  0x2d   :  { %v63_v12 = vld [vmem:[#allocation3 + $0x8] sm:$0xff]  ;;  %v78_v15 = vpack.c.bf16 %v62_v11, %v62_v11  ;;  %v66_v16 = vld [vmem:[#allocation3 + $0x20] sm:$0xff]  ;;  %v69_v23 = vld [vmem:[#allocation3 + $0x38] sm:$0xff]  ;;  %v81_v27 = vpack.c.bf16 %v68_v18, %v68_v18  ;;  %vm164_vm4 = vcmask 1045509   ;;  %vm167_vm5 = vcmask 1046534  }
  0x2e   :  { %v67_v17 = vld [vmem:[#allocation3 + $0x28] sm:$0xff]  ;;  %v934_v20 = vpack.c.bf16 %v63_v12, %v62_v11  ;;  %v70_v24 = vld [vmem:[#allocation3 + $0x40] sm:$0xff]  ;;  %v80_v26 = vpack.c.bf16 %v66_v16, %v66_v16  ;;  %v72_v30 = vld [vmem:[#allocation3 + $0x50] sm:$0xff]  ;;  %v144_v34 = vunpack.c.l.b16 %v79_v19  ;;  %972 = vst [vmem:[#allocation2 + $0x10] sm:$0xff] %v939_v21   ;;  %v949_v35 = vpack.c.bf16 %v69_v23, %v68_v18 }
  0x2f   :  { %305 = vmatpush1.bf16.msra.mxu1 %v1110_v5  ;;  %v1119_v22 = vld [vmem:[#allocation5 + $0x48] ss:$12 sps:$4 sm:$0xff]   ;;  %v143_v28 = vunpack.c.l.b16 %v78_v15  ;;  %v944_v29 = vpack.c.bf16 %v67_v17, %v66_v16  ;;  %v73_v31 = vld [vmem:[#allocation3 + $0x58] sm:$0xff]  ;;  %v74_v32 = vld [vmem:[#allocation3 + $0x60] sm:$0xff]  ;;  %v82_v33 = vpack.c.bf16 %v70_v24, %v70_v24  ;;  %v83_v40 = vpack.c.bf16 %v72_v30, %v72_v30 }
  0x30   :  { %306 = vmatprep.subr.bf16.mxu1 %v1111_v6  ;;  %v71_v25 = vld [vmem:[#allocation3 + $0x48] sm:$0xff]  ;;  %971 = vst [vmem:[#allocation2 + $0x8] sm:$0xff] %v934_v20   ;;  %v1120_v37 = vld [vmem:[#allocation5 + $0x34] ss:$12 sps:$4 sm:$0xff]   ;;  %v84_v41 = vpack.c.bf16 %v74_v32, %v74_v32  ;;  %v145_v42 = vunpack.c.l.b16 %v80_v26  ;;  %v146_v43 = vunpack.c.l.b16 %v81_v27  ;;  %v77_v44 = vld [vmem:[#allocation3 + $0x78] sm:$0xff]  ;;  %v151_v47 = vrot.slane %v144_v34, 7 }
  0x31   :  { %v954_v36 = vpack.c.bf16 %v71_v25, %v70_v24  ;;  %v75_v38 = vld [vmem:[#allocation3 + $0x68] sm:$0xff]  ;;  %v76_v39 = vld [vmem:[#allocation3 + $0x70] sm:$0xff]  ;;  %973 = vst [vmem:[#allocation2 + $0x18] sm:$0xff] %v944_v29   ;;  %v147_v46 = vunpack.c.l.b16 %v82_v33  ;;  %974 = vst [vmem:[#allocation2 + $0x20] sm:$0xff] %v949_v35   ;;  %v959_v48 = vpack.c.bf16 %v73_v31, %v72_v30  ;;  %v148_v49 = vunpack.c.l.b16 %v83_v40 }
  0x32   :  { %v85_v45 = vpack.c.bf16 %v76_v39, %v76_v39  ;;  %v149_v50 = vunpack.c.l.b16 %v84_v41  ;;  %v154_v51 = vrot.slane %v145_v42, 6  ;;  %v157_v52 = vrot.slane %v146_v43, 5  ;;  %v1122_v53 = vld [vmem:[#allocation5 + $0x30] ss:$12 sps:$4 sm:$0xff]   ;;  %v1125_v2 = vld [vmem:[#allocation5 + $0x18] ss:$12 sps:$4 sm:$0xff]  }
  0x33   :  { %307 = vmatpush1.bf16.msra.mxu1 %v1113_v7  ;;  %975 = vst [vmem:[#allocation2 + $0x28] sm:$0xff] %v954_v36   ;;  %v153_v54 = vsel %vm152_vm0, %v151_v47, %v143_v28  ;;  %v160_v55 = vrot.slane %v147_v46, 4  ;;  %976 = vst [vmem:[#allocation2 + $0x30] sm:$0xff] %v959_v48   ;;  %v964_v56 = vpack.c.bf16 %v75_v38, %v74_v32  ;;  %v163_v59 = vrot.slane %v148_v49, 3  ;;  %v1123_v61 = vld [vmem:[#allocation5 + $0x1c] ss:$12 sps:$4 sm:$0xff]  }
  0x34   :  { %308 = vmatprep.subr.bf16.mxu1 %v1114_v8  ;;  %v150_v57 = vunpack.c.l.b16 %v85_v45  ;;  %v156_v58 = vsel %vm155_vm1, %v154_v51, %v153_v54  ;;  %v969_v60 = vpack.c.bf16 %v77_v44, %v76_v39  ;;  %v166_v63 = vrot.slane %v149_v50, 2  ;;  %v1126_v5 = vld [vmem:[#allocation5 + $0x4] ss:$12 sps:$4 sm:$0xff]   ;;  %v1128_v7 = vld [vmem:[#allocation5] ss:$12 sps:$4 sm:$0xff]  }
  0x35   :  { %v159_v62 = vsel %vm158_vm2, %v157_v52, %v156_v58  ;;  %977 = vst [vmem:[#allocation2 + $0x38] sm:$0xff] %v964_v56   ;;  %vm170_vm6 = vcmask 1047559   ;;  %v1130_v11 = vld [vmem:[#allocation5 + $0x98] ss:$12 sps:$4 sm:$0xff]   ;;  %v1131_v12 = vld [vmem:[#allocation5 + $0x80] ss:$12 sps:$4 sm:$0xff]   ;;  %v120_v18 = vlaneseq }
  0x36   :  { %v162_v0 = vsel %vm161_vm3, %v160_v55, %v159_v62  ;;  %978 = vst [vmem:[#allocation2 + $0x40] sm:$0xff] %v969_v60   ;;  %v169_v4 = vrot.slane %v150_v57, 1  ;;  %v1132_v13 = vld [vmem:[#allocation5 + $0x68] ss:$12 sps:$4 sm:$0xff]   ;;  %v1133_v14 = vld [vmem:[#allocation5 + $0x50] ss:$12 sps:$4 sm:$0xff]  }
  0x37   :  { %309 = vmatpush1.bf16.msra.mxu1 %v1116_v9  ;;  %v165_v3 = vsel %vm164_vm4, %v163_v59, %v162_v0  ;;  %v1129_v9 = vld [vmem:[#allocation5 + $0xb0] ss:$12 sps:$4 sm:$0xff]   ;;  %v1134_v15 = vld [vmem:[#allocation5 + $0x38] ss:$12 sps:$4 sm:$0xff]   ;;  %v1135_v16 = vld [vmem:[#allocation5 + $0x20] ss:$12 sps:$4 sm:$0xff]  }
  0x38   :  { %310 = vmatprep.subr.bf16.mxu1 %v1117_v10  ;;  %v168_v6 = vsel %vm167_vm5, %v166_v63, %v165_v3  ;;  %v1136_v17 = vld [vmem:[#allocation5 + $0x8] ss:$12 sps:$4 sm:$0xff]   ;;  %vm1233_vm7 = vmmov 0   ;;  %v121_v19 = vshrl.u32 %v120_v18, 7  ;;  %v118_v21 = vld [vmem:[%s1406_s2] sm:$0x7] }
  0x39   :  { %v171_v8 = vsel %vm170_vm6, %v169_v4, %v168_v6  ;;  %1057 = vmatprep.mubr.msk.bf16.mxu0 %vm1233_vm7, %v1232_v1  ;;  %vm442_vm8 = vcmask 1043456   ;;  %vm425_vm9 = vcmask 64512   ;;  %v1137_v52 = vld [vmem:[#allocation7 + $0x38] sm:$0xff]   ;;  %v1139_v54 = vld [vmem:[#allocation7 + $0x28] sm:$0xff]   ;;  %v1140_v55 = vld [vmem:[#allocation7 + $0x20] sm:$0xff]  }
  0x3a   :  { %v172_v10 = vpack.c.b16 %v171_v8, %v171_v8  ;;  %v126_v20 = vsub.s32 1, %v121_v19  ;;  %v122_v23 = vsub.s32 0, %v121_v19  ;;  %v130_v33 = vsub.s32 2, %v121_v19  ;;  %1042 = vmatpush3.bf16.msra.mxu0 %v1137_v52  ;;  %v1141_v56 = vld [vmem:[#allocation7 + $0x18] sm:$0xff]   ;;  %v1143_v62 = vld [vmem:[#allocation7 + $0x8] sm:$0xff]   ;;  %v1144_v63 = vld [vmem:[#allocation7] sm:$0xff]  }
  0x3b   :  { %311 = vmatpush1.bf16.msra.mxu1 %v1119_v22  ;;  %1043 = vmatprep.subr.bf16.mxu0 %v1232_v1  ;;  %v1147_v8 = vld [vmem:[#allocation2 + $0x10] sm:$0xff]  }
  0x3c   :  { %312 = vmatprep.subr.bf16.mxu1 %v1120_v37  ;;  %v127_v22 = vrot.slane %v118_v21, %v126_v20  ;;  %v123_v27 = vrot.slane %v118_v21, %v122_v23  ;;  %v131_v34 = vrot.slane %v118_v21, %v130_v33 }
  0x3f   :  { %313 = vmatpush1.bf16.msra.mxu1 %v1122_v53  ;;  %v1138_v53 = vld [vmem:[#allocation7 + $0x30] sm:$0xff]  }
  0x40   :  { %314 = vmatprep.subr.bf16.mxu1 %v1123_v61  ;;  %1044 = vmatpush3.bf16.msra.mxu0 %v1138_v53  ;;  %v1142_v61 = vld [vmem:[#allocation7 + $0x10] sm:$0xff]  }
  0x41   :  { %1045 = vmatprep.subr.bf16.mxu0 %v1232_v1 }
  0x43   :  { %315 = vmatpush1.bf16.msra.mxu1 %v1125_v2 }
  0x44   :  { %316 = vmatprep.subr.bf16.mxu1 %v1126_v5  ;;  %1046 = vmatpush3.bf16.msra.mxu0 %v1139_v54 }
  0x45   :  { %1047 = vmatprep.subr.bf16.mxu0 %v1232_v1 }
  0x47   :  { %317 = vmatpush1.bf16.msra.mxu1 %v1128_v7  ;;  %v1146_v7 = vld [vmem:[#allocation2 + $0x8] sm:$0xff]  }
  0x48   :  { %1009 = vmatprep.subr.bf16.mxu1 %v1232_v1  ;;  %1048 = vmatpush3.bf16.msra.mxu0 %v1140_v55 }
  0x49   :  { %1049 = vmatprep.subr.bf16.mxu0 %v1232_v1 }
  0x4a   :  { %335 = vmatmul.mubr.bf16.vlgmr.msra.gmra.mxu1 %v172_v10 }
  0x4b   :  { %1010 = vmatpush3.bf16.msra.mxu1 %v1129_v9  ;;  %1025 = vmatprep.mubr.msk.bf16.mxu1 %vm1233_vm7, %v1232_v1  ;;  %v1148_v9 = vld [vmem:[#allocation2 + $0x18] sm:$0xff]  }
  0x4c   :  { %1011 = vmatprep.subr.bf16.mxu1 %v1232_v1  ;;  %1050 = vmatpush3.bf16.msra.mxu0 %v1141_v56 }
  0x4d   :  { %1051 = vmatprep.subr.bf16.mxu0 %v1232_v1 }
  0x4f   :  { %1012 = vmatpush3.bf16.msra.mxu1 %v1130_v11  ;;  %v1150_v11 = vld [vmem:[#allocation2 + $0x28] sm:$0xff]  }
  0x50   :  { %1013 = vmatprep.subr.bf16.mxu1 %v1232_v1  ;;  %1052 = vmatpush3.bf16.msra.mxu0 %v1142_v61 }
  0x51   :  { %1053 = vmatprep.subr.bf16.mxu0 %v1232_v1 }
  0x53   :  { %1014 = vmatpush3.bf16.msra.mxu1 %v1131_v12  ;;  %v1151_v12 = vld [vmem:[#allocation2 + $0x30] sm:$0xff]  }
  0x54   :  { %1015 = vmatprep.subr.bf16.mxu1 %v1232_v1  ;;  %1054 = vmatpush3.bf16.msra.mxu0 %v1143_v62 }
  0x55   :  { %1055 = vmatprep.subr.bf16.mxu0 %v1232_v1 }
  0x57   :  { %1016 = vmatpush3.bf16.msra.mxu1 %v1132_v13  ;;  %v1152_v13 = vld [vmem:[#allocation2 + $0x38] sm:$0xff]  }
  0x58   :  { %1017 = vmatprep.subr.bf16.mxu1 %v1232_v1  ;;  %1056 = vmatpush3.bf16.msra.mxu0 %v1144_v63 }
  0x5b   :  { %1018 = vmatpush3.bf16.msra.mxu1 %v1133_v14  ;;  %v1153_v14 = vld [vmem:[#allocation2 + $0x40] sm:$0xff]  }
  0x5c   :  { %1019 = vmatprep.subr.bf16.mxu1 %v1232_v1 }
  0x5f   :  { %1020 = vmatpush3.bf16.msra.mxu1 %v1134_v15  ;;  %v1330_v15 = vld [vmem:[%s1408_s4] ss:$0 sm:$0xff] }
  0x60   :  { %1021 = vmatprep.subr.bf16.mxu1 %v1232_v1 }
  0x63   :  { %1022 = vmatpush3.bf16.msra.mxu1 %v1135_v16 }
  0x64   :  { %1023 = vmatprep.subr.bf16.mxu1 %v1232_v1 }
  0x67   :  { %1024 = vmatpush3.bf16.msra.mxu1 %v1136_v17 }
  0x68   :  { %1029 = vmatprep.subr.bf16.mxu1 %v1232_v1 }
  0x6a   :  { %1026 = vmatmul.mubr.bf16.vlgmr.msra.gmra.mxu1 %v172_v10  ;;  %v1149_v10 = vld [vmem:[#allocation2 + $0x20] sm:$0xff]  }
  0x6b   :  { %1031 = vmatprep.mubr.msk.bf16.mxu1 %vm1233_vm7, %v1232_v1 }
 0x10a   :  { %v336_v24 = vpop.f32.mrf.mxu1 }
 0x10b   :  { %v337_v31 = vadd.f32 %v336_v24, %v123_v27 }
 0x10c   :  { %v338_v25 = vpop.f32.mrf.mxu1 }
 0x10d   :  { %v339_v26 = vadd.f32 %v338_v25, %v127_v22  ;;  %v383_v32 = vpack.c.bf16 %v337_v31, %v337_v31 }
 0x10e   :  { %v340_v28 = vpop.f32.mrf.mxu1 }
 0x10f   :  { %v384_v29 = vpack.c.bf16 %v339_v26, %v339_v26 }
 0x110   :  { %v341_v30 = vpop.f32.mrf.mxu1 }
 0x111   :  { %1030 = vmatpush3.bf16.xpose.msra.mxu1 %v384_v29 }
 0x112   :  { %1035 = vmatprep.subr.bf16.mxu1 %v1232_v1 }
 0x118   :  { %1032 = vmatmul.mubr.bf16.vlgmr.msra.gmra.mxu1 %v383_v32 }
 0x119   :  { %1037 = vmatprep.mubr.msk.bf16.mxu1 %vm1233_vm7, %v1232_v1 }
 0x12a   :  { %v377_v35 = vpop.f32.mrf.mxu1 }
 0x12b   :  { %v378_v36 = vadd.f32 %v377_v35, %v131_v34 }
 0x12c   :  { %v1027_v37 = vpop.f32.mrf.mxu1 }
 0x12d   :  { %v438_v38 = vpack.c.bf16 %v378_v36, %v378_v36 }
 0x12e   :  { %v380_v39 = vpop.f32.mrf.mxu1 }
 0x12f   :  { %v444_v40 = vsel %vm442_vm8, %v438_v38, 0 }
 0x130   :  { %v1028_v41 = vpop.f32.mrf.mxu1  ;;  %1036 = vmatpush3.bf16.msra.mxu1 %v444_v40 }
 0x1d8   :  { %v419_v42 = vpop.f32.mrf.mxu1 }
 0x1d9   :  { %v426_v43 = vsel %vm425_vm9, %v419_v42, -inf }
 0x1da   :  { %427 = vmax.xlane.f32.xlu0 %v426_v43  ;;  %v1033_v44 = vpop.f32.mrf.mxu1 }
 0x1dc   :  { %v422_v45 = vpop.f32.mrf.mxu1 }
 0x1de   :  { %v1034_v46 = vpop.f32.mrf.mxu1 }
 0x263   :  { %v428_v47 = vpop.xlane.xlu0 %427 }
 0x264   :  { %v429_v48 = vsub.f32 %v419_v42, %v428_v47 }
 0x266   :  { %v430_v49 = vmul.f32 1.442695, %v429_v48 }
 0x268   :  { %1154 = vpow2.f32 %v430_v49 }
 0x275   :  { %v1155_v50 = vpop.eup %1154 }
 0x276   :  { %v432_v51 = vsel %vm425_vm9, %v1155_v50, 0.0 }
 0x277   :  { %433 = vadd.xlane.f32.xlu0 %v432_v51 }
 0x300   :  { %v434_v57 = vpop.xlane.xlu0 %433 }
 0x301   :  { %1156 = vrcp.f32 %v434_v57 }
 0x30e   :  { %v1157_v58 = vpop.eup %1156 }
 0x30f   :  { %v436_v59 = vmul.f32 %v1157_v58, %v1155_v50 }
 0x311   :  { %v437_v60 = vpack.c.bf16 %v436_v59, %v436_v59 }
 0x313   :  { %1038 = vmatmul.mubr.msk.bf16.vlgmr.msra.gmra.mxu1 %vm425_vm9, %v437_v60 }
 0x3d3   :  { %v480_v0 = vpop.f32.mrf.mxu1 }
 0x3d4   :  { %v929_v2 = vpack.c.bf16 %v1232_v1, %v480_v0 }
 0x3d5   :  { %v1039_v3 = vpop.f32.mrf.mxu1 }
 0x3d6   :  { %930 = vst [vmem:[#allocation2] sm:$0xff] %v929_v2  }
 0x3d7   :  { %v483_v4 = vpop.f32.mrf.mxu1 }
 0x3d9   :  { %v1040_v5 = vpop.f32.mrf.mxu1 }
 0x3dd   :  { %v1145_v6 = vld [vmem:[#allocation2] sm:$0xff]  }
 0x3de   :  { %1058 = vmatmul.mubr.bf16.vlgmr.msra.gmra.mxu0 %v1145_v6 }
 0x3df   :  { %1061 = vmatprep.mubr.msk.bf16.mxu0 %vm1233_vm7, %v1232_v1 }
 0x3e6   :  { %1062 = vmatmul.mubr.bf16.gmra.mxu0 %v1146_v7 }
 0x3e7   :  { %1065 = vmatprep.mubr.msk.bf16.mxu0 %vm1233_vm7, %v1232_v1 }
 0x3ee   :  { %1066 = vmatmul.mubr.bf16.gmra.mxu0 %v1147_v8 }
 0x3ef   :  { %1069 = vmatprep.mubr.msk.bf16.mxu0 %vm1233_vm7, %v1232_v1 }
 0x3f6   :  { %1070 = vmatmul.mubr.bf16.gmra.mxu0 %v1148_v9 }
 0x3f7   :  { %1073 = vmatprep.mubr.msk.bf16.mxu0 %vm1233_vm7, %v1232_v1 }
 0x3fe   :  { %1074 = vmatmul.mubr.bf16.gmra.mxu0 %v1149_v10 }
 0x3ff   :  { %1077 = vmatprep.mubr.msk.bf16.mxu0 %vm1233_vm7, %v1232_v1 }
 0x406   :  { %1078 = vmatmul.mubr.bf16.gmra.mxu0 %v1150_v11 }
 0x407   :  { %1081 = vmatprep.mubr.msk.bf16.mxu0 %vm1233_vm7, %v1232_v1 }
 0x40e   :  { %1082 = vmatmul.mubr.bf16.gmra.mxu0 %v1151_v12 }
 0x40f   :  { %1085 = vmatprep.mubr.msk.bf16.mxu0 %vm1233_vm7, %v1232_v1 }
 0x416   :  { %1086 = vmatmul.mubr.bf16.gmra.mxu0 %v1152_v13 }
 0x417   :  { %1089 = vmatprep.mubr.msk.bf16.mxu0 %vm1233_vm7, %v1232_v1 }
 0x41e   :  { %1090 = vmatmul.mubr.bf16.gmra.mxu0 %v1153_v14 }
 0x49e   :  { %v753_v16 = vpop.f32.mrf.mxu0 }
 0x49f   :  { %v754_v17 = vadd.f32 %v1330_v15, %v753_v16 }
 0x4a0   :  { %v1059_v18 = vpop.f32.mrf.mxu0 }
 0x4a1   :  { %824 = vst [vmem:[%s1409_s5] sm:$0xff] %v754_v17 }
 0x4a2   :  { %v756_v19 = vpop.f32.mrf.mxu0 }
 0x4a3   :  { %v757_v20 = vadd.f32 %v1330_v15, %v756_v19 }
 0x4a4   :  { %v1060_v21 = vpop.f32.mrf.mxu0 }
 0x4a5   :  { %825 = vst [vmem:[%s1409_s5 + $0x8] sm:$0xff] %v757_v20 }
 0x4a6   :  { %v761_v1 = vpop.f32.mrf.mxu0 }
 0x4a7   :  { %v762_v22 = vadd.f32 %v1330_v15, %v761_v1 }
 0x4a8   :  { %v1063_v23 = vpop.f32.mrf.mxu0 }
 0x4a9   :  { %826 = vst [vmem:[%s1409_s5 + $0x10] sm:$0xff] %v762_v22 }
 0x4aa   :  { %v764_v24 = vpop.f32.mrf.mxu0 }
 0x4ab   :  { %v765_v25 = vadd.f32 %v1330_v15, %v764_v24 }
 0x4ac   :  { %v1064_v26 = vpop.f32.mrf.mxu0 }
 0x4ad   :  { %827 = vst [vmem:[%s1409_s5 + $0x18] sm:$0xff] %v765_v25 }
 0x4ae   :  { %v769_v27 = vpop.f32.mrf.mxu0 }
 0x4af   :  { %v770_v28 = vadd.f32 %v1330_v15, %v769_v27 }
 0x4b0   :  { %v1067_v29 = vpop.f32.mrf.mxu0 }
 0x4b1   :  { %828 = vst [vmem:[%s1409_s5 + $0x20] sm:$0xff] %v770_v28 }
 0x4b2   :  { %v772_v30 = vpop.f32.mrf.mxu0 }
 0x4b3   :  { %v773_v31 = vadd.f32 %v1330_v15, %v772_v30 }
 0x4b4   :  { %v1068_v32 = vpop.f32.mrf.mxu0 }
 0x4b5   :  { %829 = vst [vmem:[%s1409_s5 + $0x28] sm:$0xff] %v773_v31 }
 0x4b6   :  { %v777_v33 = vpop.f32.mrf.mxu0 }
 0x4b7   :  { %v778_v34 = vadd.f32 %v1330_v15, %v777_v33 }
 0x4b8   :  { %v1071_v35 = vpop.f32.mrf.mxu0 }
 0x4b9   :  { %830 = vst [vmem:[%s1409_s5 + $0x30] sm:$0xff] %v778_v34 }
 0x4ba   :  { %v780_v36 = vpop.f32.mrf.mxu0 }
 0x4bb   :  { %v781_v37 = vadd.f32 %v1330_v15, %v780_v36 }
 0x4bc   :  { %v1072_v38 = vpop.f32.mrf.mxu0 }
 0x4bd   :  { %831 = vst [vmem:[%s1409_s5 + $0x38] sm:$0xff] %v781_v37 }
 0x4be   :  { %v785_v39 = vpop.f32.mrf.mxu0 }
 0x4bf   :  { %v786_v40 = vadd.f32 %v1330_v15, %v785_v39 }
 0x4c0   :  { %v1075_v41 = vpop.f32.mrf.mxu0 }
 0x4c1   :  { %832 = vst [vmem:[%s1409_s5 + $0x40] sm:$0xff] %v786_v40 }
 0x4c2   :  { %v788_v42 = vpop.f32.mrf.mxu0 }
 0x4c3   :  { %v789_v43 = vadd.f32 %v1330_v15, %v788_v42 }
 0x4c4   :  { %v1076_v44 = vpop.f32.mrf.mxu0 }
 0x4c5   :  { %833 = vst [vmem:[%s1409_s5 + $0x48] sm:$0xff] %v789_v43 }
 0x4c6   :  { %v793_v45 = vpop.f32.mrf.mxu0 }
 0x4c7   :  { %v794_v46 = vadd.f32 %v1330_v15, %v793_v45 }
 0x4c8   :  { %v1079_v47 = vpop.f32.mrf.mxu0 }
 0x4c9   :  { %834 = vst [vmem:[%s1409_s5 + $0x50] sm:$0xff] %v794_v46 }
 0x4ca   :  { %v796_v48 = vpop.f32.mrf.mxu0 }
 0x4cb   :  { %v797_v49 = vadd.f32 %v1330_v15, %v796_v48 }
 0x4cc   :  { %v1080_v50 = vpop.f32.mrf.mxu0 }
 0x4cd   :  { %835 = vst [vmem:[%s1409_s5 + $0x58] sm:$0xff] %v797_v49 }
 0x4ce   :  { %v801_v51 = vpop.f32.mrf.mxu0 }
 0x4cf   :  { %v802_v52 = vadd.f32 %v1330_v15, %v801_v51 }
 0x4d0   :  { %v1083_v53 = vpop.f32.mrf.mxu0 }
 0x4d1   :  { %836 = vst [vmem:[%s1409_s5 + $0x60] sm:$0xff] %v802_v52 }
 0x4d2   :  { %v804_v54 = vpop.f32.mrf.mxu0 }
 0x4d3   :  { %v805_v55 = vadd.f32 %v1330_v15, %v804_v54 }
 0x4d4   :  { %v1084_v56 = vpop.f32.mrf.mxu0 }
 0x4d5   :  { %837 = vst [vmem:[%s1409_s5 + $0x68] sm:$0xff] %v805_v55 }
 0x4d6   :  { %v809_v57 = vpop.f32.mrf.mxu0 }
 0x4d7   :  { %v810_v58 = vadd.f32 %v1330_v15, %v809_v57 }
 0x4d8   :  { %v1087_v59 = vpop.f32.mrf.mxu0 }
 0x4d9   :  { %838 = vst [vmem:[%s1409_s5 + $0x70] sm:$0xff] %v810_v58 }
 0x4da   :  { %v812_v60 = vpop.f32.mrf.mxu0 }
 0x4db   :  { %v813_v61 = vadd.f32 %v1330_v15, %v812_v60 }
 0x4dc   :  { %v1088_v62 = vpop.f32.mrf.mxu0 }
 0x4dd   :  { %839 = vst [vmem:[%s1409_s5 + $0x78] sm:$0xff] %v813_v61 }
 0x4de   :  { %v817_v63 = vpop.f32.mrf.mxu0 }
 0x4df   :  { %v818_v0 = vadd.f32 %v1330_v15, %v817_v63 }
 0x4e0   :  { %v1091_v2 = vpop.f32.mrf.mxu0 }
 0x4e1   :  { %840 = vst [vmem:[%s1409_s5 + $0x80] sm:$0xff] %v818_v0 }
 0x4e2   :  { %v820_v3 = vpop.f32.mrf.mxu0 }
 0x4e3   :  { %v821_v4 = vadd.f32 %v1330_v15, %v820_v3 }
 0x4e4   :  { %v1092_v5 = vpop.f32.mrf.mxu0 }
 0x4e5   :  { %841 = vst [vmem:[%s1409_s5 + $0x88] sm:$0xff] %v821_v4 }
 0x4e6   :  { %846 = vsyncpa [#allocation4], 1 }
 0x4e7   :  { %847 = vsyncpa [#allocation6], 1 }

</bundles_post_ra>
